<compile_context>
chip_gen: v7x
topology: tpu7x:2x2x1
jax: 0.10.0
libtpu: 0.0.40
codegen_flags: <defaults>
</compile_context>

<pallas_src>
import numpy as np
import jax
import jax.numpy as jnp
from jax import lax
from jax.experimental import pallas as pl
from jax.experimental.pallas import tpu as pltpu

# Model hyper-parameters (small, consistent with the module's __init__ signature).
D_MODEL = 32
NHEAD = 4                      # must be even for parity with the torch fast path
HEAD_DIM = D_MODEL // NHEAD
DIM_FF = 64
LN_EPS = 1e-5

SEQ = 8
BATCH = 2

NEG_INF = -1e30


def encoder_layer_kernel(x_ref, wq_ref, wk_ref, wv_ref, wo_ref, w1_ref, w2_ref,
                         bias_ref, hmask_ref, amask_ref, o_ref):
    """One grid step = one block of `RB` rows (a group of complete sequences).

    x_ref    : (RB, D)      rows ordered (b, s) within the block
    wq/k/v/o : (D, D)       pre-transposed; Wq^T and bq pre-scaled by 1/sqrt(hd)
    w1_ref   : (D, F), w2_ref : (F, D)
    bias_ref : (16, 128)    rows: bq,bk,bv,bo, ln1_g,ln1_b, ln2_g,ln2_b, b1,b2
    hmask_ref: (NHEAD*RB, D)   multiplicative per-head column mask (0/1)
    amask_ref: (NHEAD*RB, RB)  additive cross-batch mask (0 / -1e30)
    """
    D, F = D_MODEL, DIM_FF
    x = x_ref[...]                                          # (RB, D)
    RB = x.shape[0]
    b = bias_ref[...]

    # ---- Q/K/V projections: three aligned dots (scale folded into Wq/bq) ----
    q = jnp.dot(x, wq_ref[...], preferred_element_type=jnp.float32) + b[0:1, 0:D]
    k = jnp.dot(x, wk_ref[...], preferred_element_type=jnp.float32) + b[1:2, 0:D]
    v = jnp.dot(x, wv_ref[...], preferred_element_type=jnp.float32) + b[2:3, 0:D]

    # ---- packed-head attention: every head & sequence in two matmuls ----
    hmask = hmask_ref[...]                                  # (NHEAD*RB, D)
    q_stack = jnp.concatenate([q] * NHEAD, axis=0) * hmask  # (NHEAD*RB, D)
    s = lax.dot_general(q_stack, k, (((1,), (1,)), ((), ())),
                        preferred_element_type=jnp.float32)  # (NHEAD*RB, RB)
    s = s + amask_ref[...]                                   # mask cross-batch keys

    s = s - jnp.max(s, axis=-1, keepdims=True)
    p = jnp.exp(s)
    p = p * (1.0 / jnp.sum(p, axis=-1, keepdims=True))       # exact reciprocal

    o_stack = jnp.dot(p, v, preferred_element_type=jnp.float32) * hmask
    attn = o_stack[0:RB]
    for h in range(1, NHEAD):                                 # disjoint column support
        attn = attn + o_stack[h * RB:(h + 1) * RB]            # (RB, D)

    # output projection
    attn = jnp.dot(attn, wo_ref[...], preferred_element_type=jnp.float32) + b[3:4, 0:D]

    # ---- residual + LayerNorm 1 (post-norm; dropout1 identity in eval) ----
    y = x + attn
    mu = jnp.mean(y, axis=-1, keepdims=True)
    var = jnp.mean(y * y, axis=-1, keepdims=True) - mu * mu   # one-pass variance
    y1 = (y - mu) * lax.rsqrt(var + LN_EPS) * b[4:5, 0:D] + b[5:6, 0:D]

    # ---- feed-forward block (dropout identity in eval) ----
    hdd = jnp.dot(y1, w1_ref[...], preferred_element_type=jnp.float32) + b[8:9, 0:F]
    hdd = jnp.maximum(hdd, 0.0)                               # ReLU
    ff = jnp.dot(hdd, w2_ref[...], preferred_element_type=jnp.float32) + b[9:10, 0:D]

    # ---- residual + LayerNorm 2 ----
    y = y1 + ff
    mu2 = jnp.mean(y, axis=-1, keepdims=True)
    var2 = jnp.mean(y * y, axis=-1, keepdims=True) - mu2 * mu2
    # TODO(synk): output last dim is 32 (<128 lanes) -> masked stores; only worth
    # widening to a lane-dense slab once writeback volume becomes non-trivial.
    o_ref[...] = (y - mu2) * lax.rsqrt(var2 + LN_EPS) * b[6:7, 0:D] + b[7:8, 0:D]


def make_params(key):
    ks = jax.random.split(key, 12)
    f32 = jnp.float32
    return dict(
        wqkv=jax.random.normal(ks[0], (3 * D_MODEL, D_MODEL), f32) * 0.05,
        bqkv=jax.random.normal(ks[1], (3 * D_MODEL,), f32) * 0.02,
        wo=jax.random.normal(ks[2], (D_MODEL, D_MODEL), f32) * 0.05,
        bo=jax.random.normal(ks[3], (D_MODEL,), f32) * 0.02,
        ln1w=1.0 + 0.1 * jax.random.normal(ks[8], (D_MODEL,), f32),
        ln1b=0.05 * jax.random.normal(ks[9], (D_MODEL,), f32),
        ln2w=1.0 + 0.1 * jax.random.normal(ks[10], (D_MODEL,), f32),
        ln2b=0.05 * jax.random.normal(ks[11], (D_MODEL,), f32),
        w1=jax.random.normal(ks[4], (DIM_FF, D_MODEL), f32) * 0.05,
        b1=jax.random.normal(ks[5], (DIM_FF,), f32) * 0.02,
        w2=jax.random.normal(ks[6], (D_MODEL, DIM_FF), f32) * 0.05,
        b2=jax.random.normal(ks[7], (D_MODEL,), f32) * 0.02,
    )


def pack_params(p):
    """One-time packing of the PyTorch-layout tensors into lane-aligned refs."""
    D = D_MODEL
    scale = 1.0 / np.sqrt(np.float32(HEAD_DIM))

    wq = p["wqkv"][0:D] * scale          # fold attention scale into Q projection
    wk = p["wqkv"][D:2 * D]
    wv = p["wqkv"][2 * D:3 * D]
    bq = p["bqkv"][0:D] * scale
    bk = p["bqkv"][D:2 * D]
    bv = p["bqkv"][2 * D:3 * D]

    # Pre-transposed so x @ W^T becomes x @ ref (no in-kernel transpose); every
    # weight is its own ref -> all loads are full, tile-aligned views.
    wq_t, wk_t, wv_t = wq.T, wk.T, wv.T          # (D, D) each
    wo_t = p["wo"].T                             # (D, D)
    w1_t = p["w1"].T                             # (D, F)
    w2_t = p["w2"].T                             # (F, D)

    def row(v):
        v = v.reshape(-1)
        return jnp.pad(v, (0, 128 - v.shape[0]))

    biases = jnp.stack([row(bq), row(bk), row(bv), row(p["bo"]),
                        row(p["ln1w"]), row(p["ln1b"]),
                        row(p["ln2w"]), row(p["ln2b"]),
                        row(p["b1"]), row(p["b2"])], axis=0)
    biases = jnp.pad(biases, ((0, 16 - biases.shape[0]), (0, 0)))   # (16, 128)
    return wq_t, wk_t, wv_t, wo_t, w1_t, w2_t, biases


def make_masks(rows_per_block, seq):
    """Host-precomputed masks (compile-time constants per block shape)."""
    RH = NHEAD * rows_per_block
    # multiplicative head mask: stacked row g (head = g // RB) keeps only the
    # columns of its head's HEAD_DIM-wide slice of d_model.
    row_h = (np.arange(RH) // rows_per_block)[:, None]
    col_h = (np.arange(D_MODEL) // HEAD_DIM)[None, :]
    hmask = (row_h == col_h).astype(np.float32)                     # (RH, D)
    # additive cross-batch mask: rows within a block are (b, s)-ordered.
    ri = (np.arange(RH) % rows_per_block) // seq
    ci = np.arange(rows_per_block) // seq
    amask = np.where(ri[:, None] == ci[None, :], 0.0, NEG_INF).astype(np.float32)
    return jnp.asarray(hmask), jnp.asarray(amask)


def encoder_layer(src_sbd, packed, *, batches_per_block=None):
    """src_sbd: (S, B, D) float32 (PyTorch batch_first=False layout)."""
    wq_t, wk_t, wv_t, wo_t, w1_t, w2_t, biases = packed
    S, B, D = src_sbd.shape

    if batches_per_block is None:
        # TODO(synk): for large batches on v6e/v7x pick batches_per_block so the
        # row block reaches >=256 rows (MXU fill) while staying inside v7x's
        # 64 MiB VMEM; at the demo sizes the whole batch fits one block.
        batches_per_block = min(B, 32)
    bpb = batches_per_block
    Bp = ((B + bpb - 1) // bpb) * bpb             # pad batch to a block multiple
    RB = bpb * S                                  # rows per block
    assert RB % 8 == 0, "rows-per-block must be sublane (8) aligned"

    x_bsd = jnp.transpose(src_sbd, (1, 0, 2))     # (B, S, D): blocks = whole sequences
    if Bp != B:
        x_bsd = jnp.pad(x_bsd, ((0, Bp - B), (0, 0), (0, 0)))
    x2d = x_bsd.reshape(Bp * S, D)

    hmask, amask = make_masks(RB, S)
    n_blocks = Bp // bpb
    pinned = lambda i: (0, 0)                     # weights/masks resident across steps

    out = pl.pallas_call(
        encoder_layer_kernel,
        out_shape=jax.ShapeDtypeStruct((Bp * S, D), jnp.float32),
        grid_spec=pltpu.PrefetchScalarGridSpec(
            num_scalar_prefetch=0,
            grid=(n_blocks,),
            in_specs=[
                pl.BlockSpec((RB, D), lambda i: (i, 0)),     # x streams per block
                pl.BlockSpec(wq_t.shape, pinned),
                pl.BlockSpec(wk_t.shape, pinned),
                pl.BlockSpec(wv_t.shape, pinned),
                pl.BlockSpec(wo_t.shape, pinned),
                pl.BlockSpec(w1_t.shape, pinned),
                pl.BlockSpec(w2_t.shape, pinned),
                pl.BlockSpec(biases.shape, pinned),
                pl.BlockSpec(hmask.shape, pinned),
                pl.BlockSpec(amask.shape, pinned),
            ],
            out_specs=pl.BlockSpec((RB, D), lambda i: (i, 0)),
        ),
        # "parallel": blocks are independent -> v7x megacore shards them.
        compiler_params=pltpu.CompilerParams(dimension_semantics=("parallel",)),
    )(x2d, wq_t, wk_t, wv_t, wo_t, w1_t, w2_t, biases, hmask, amask)

    out = out.reshape(Bp, S, D)[:B]
    return jnp.transpose(out, (1, 0, 2))          # back to (S, B, D)


def reference(src_sbd, p):
    """Pure-JAX reference of the same (eval-mode, post-norm) forward."""
    x = jnp.transpose(src_sbd, (1, 0, 2))         # (B, S, D)
    qkv = jnp.einsum("bsd,ed->bse", x, p["wqkv"]) + p["bqkv"]
    q, k, v = jnp.split(qkv, 3, axis=-1)

    def split_heads(t):
        B, S, _ = t.shape
        return t.reshape(B, S, NHEAD, HEAD_DIM).transpose(0, 2, 1, 3)

    qh, kh, vh = split_heads(q), split_heads(k), split_heads(v)
    s = jnp.einsum("bhqd,bhkd->bhqk", qh, kh) / jnp.sqrt(jnp.float32(HEAD_DIM))
    pmat = jax.nn.softmax(s, axis=-1)
    o = jnp.einsum("bhqk,bhkd->bhqd", pmat, vh)
    o = o.transpose(0, 2, 1, 3).reshape(x.shape)
    attn = jnp.einsum("bsd,ed->bse", o, p["wo"]) + p["bo"]

    def ln(y, w, b):
        mu = jnp.mean(y, axis=-1, keepdims=True)
        var = jnp.mean((y - mu) ** 2, axis=-1, keepdims=True)
        return (y - mu) / jnp.sqrt(var + LN_EPS) * w + b

    y1 = ln(x + attn, p["ln1w"], p["ln1b"])
    h = jax.nn.relu(jnp.einsum("bsd,fd->bsf", y1, p["w1"]) + p["b1"])
    ff = jnp.einsum("bsf,df->bsd", h, p["w2"]) + p["b2"]
    y2 = ln(y1 + ff, p["ln2w"], p["ln2b"])
    return jnp.transpose(y2, (1, 0, 2))


if __name__ == "__main__":
    key = jax.random.PRNGKey(0)
    k_x, k_x2, k_p = jax.random.split(key, 3)
    params = make_params(k_p)
    packed = pack_params(params)      # done once, outside the hot path

    # 1) Base case matching the module's tiny shapes: (S=8, B=2, D=32), grid=(1,).
    src = jax.random.normal(k_x, (SEQ, BATCH, D_MODEL), jnp.float32)
    out = jax.block_until_ready(encoder_layer(src, packed))
    ref = jax.block_until_ready(reference(src, params))
    assert out.shape == (SEQ, BATCH, D_MODEL)
    assert jnp.allclose(out, ref, atol=1e-4, rtol=1e-4), "mismatch vs JAX reference"

    # 2) Super-batch case: weights/masks stay VMEM-resident while x-blocks stream
    #    across a grid=(2,) "parallel" axis (the amortization lever from review).
    src_big = jax.random.normal(k_x2, (SEQ, 16, D_MODEL), jnp.float32)
    out_big = jax.block_until_ready(
        encoder_layer(src_big, packed, batches_per_block=8))
    ref_big = jax.block_until_ready(reference(src_big, params))
    assert jnp.allclose(out_big, ref_big, atol=1e-4, rtol=1e-4), \
        "mismatch vs JAX reference (super-batch)"

    # TODO(synk): dropout layers are identity here (eval mode); training-mode
    # dropout would need pltpu.prng_* and is intentionally not faked.
    print("KERNEL_OK")
</pallas_src>

<mosaic_0001>
module attributes {stable_mosaic.version = 11 : i64} {
  func.func @encoder_layer_kernel(%arg0: i32, %arg1: memref<16x32xf32, #tpu.memory_space<vmem>>, %arg2: memref<32x32xf32, #tpu.memory_space<vmem>>, %arg3: memref<32x32xf32, #tpu.memory_space<vmem>>, %arg4: memref<32x32xf32, #tpu.memory_space<vmem>>, %arg5: memref<32x32xf32, #tpu.memory_space<vmem>>, %arg6: memref<32x64xf32, #tpu.memory_space<vmem>>, %arg7: memref<64x32xf32, #tpu.memory_space<vmem>>, %arg8: memref<16x128xf32, #tpu.memory_space<vmem>>, %arg9: memref<64x32xf32, #tpu.memory_space<vmem>>, %arg10: memref<64x16xf32, #tpu.memory_space<vmem>>, %arg11: memref<16x32xf32, #tpu.memory_space<vmem>>) attributes {dimension_semantics = [#tpu.dimension_semantics<parallel>], iteration_bounds = array<i64: 1>, scalar_prefetch = 0 : i64, scratch_operands = 0 : i64, tpu.core_type = #tpu.core_type<tc>, window_params = [{transform_indices = @transform_0, window_bounds = array<i64: 16, 32>}, {pipeline_mode = #tpu.pipeline_mode<synchronous>, transform_indices = @transform_1, window_bounds = array<i64: 32, 32>}, {pipeline_mode = #tpu.pipeline_mode<synchronous>, transform_indices = @transform_2, window_bounds = array<i64: 32, 32>}, {pipeline_mode = #tpu.pipeline_mode<synchronous>, transform_indices = @transform_3, window_bounds = array<i64: 32, 32>}, {pipeline_mode = #tpu.pipeline_mode<synchronous>, transform_indices = @transform_4, window_bounds = array<i64: 32, 32>}, {pipeline_mode = #tpu.pipeline_mode<synchronous>, transform_indices = @transform_5, window_bounds = array<i64: 32, 64>}, {pipeline_mode = #tpu.pipeline_mode<synchronous>, transform_indices = @transform_6, window_bounds = array<i64: 64, 32>}, {pipeline_mode = #tpu.pipeline_mode<synchronous>, transform_indices = @transform_7, window_bounds = array<i64: 16, 128>}, {pipeline_mode = #tpu.pipeline_mode<synchronous>, transform_indices = @transform_8, window_bounds = array<i64: 64, 32>}, {pipeline_mode = #tpu.pipeline_mode<synchronous>, transform_indices = @transform_9, window_bounds = array<i64: 64, 16>}, {transform_indices = @transform_10, window_bounds = array<i64: 16, 32>}]} {
    %c0 = arith.constant 0 : index
    %c0_0 = arith.constant 0 : index
    %0 = vector.load %arg1[%c0, %c0_0] : memref<16x32xf32, #tpu.memory_space<vmem>>, vector<16x32xf32>
    %c0_1 = arith.constant 0 : index
    %c0_2 = arith.constant 0 : index
    %1 = vector.load %arg8[%c0_1, %c0_2] : memref<16x128xf32, #tpu.memory_space<vmem>>, vector<16x128xf32>
    %c0_3 = arith.constant 0 : index
    %c0_4 = arith.constant 0 : index
    %2 = vector.load %arg2[%c0_3, %c0_4] : memref<32x32xf32, #tpu.memory_space<vmem>>, vector<32x32xf32>
    %cst = arith.constant dense<0.000000e+00> : vector<16x32xf32>
    %3 = tpu.matmul %0, %2, %cst {dimension_numbers = #tpu.dot_dimension_numbers<[1], [0], [0], [1], [0, 0, 1, 1], [], []>} : vector<16x32xf32>, vector<32x32xf32>, vector<16x32xf32> -> vector<16x32xf32>
    %4 = vector.extract_strided_slice %1 {offsets = [0, 0], sizes = [1, 32], strides = [1, 1]} : vector<16x128xf32> to vector<1x32xf32>
    %5 = vector.broadcast %4 : vector<1x32xf32> to vector<16x32xf32>
    %6 = arith.addf %3, %5 : vector<16x32xf32>
    %c0_5 = arith.constant 0 : index
    %c0_6 = arith.constant 0 : index
    %7 = vector.load %arg3[%c0_5, %c0_6] : memref<32x32xf32, #tpu.memory_space<vmem>>, vector<32x32xf32>
    %cst_7 = arith.constant dense<0.000000e+00> : vector<16x32xf32>
    %8 = tpu.matmul %0, %7, %cst_7 {dimension_numbers = #tpu.dot_dimension_numbers<[1], [0], [0], [1], [0, 0, 1, 1], [], []>} : vector<16x32xf32>, vector<32x32xf32>, vector<16x32xf32> -> vector<16x32xf32>
    %9 = vector.extract_strided_slice %1 {offsets = [1, 0], sizes = [1, 32], strides = [1, 1]} : vector<16x128xf32> to vector<1x32xf32>
    %10 = vector.broadcast %9 : vector<1x32xf32> to vector<16x32xf32>
    %11 = arith.addf %8, %10 : vector<16x32xf32>
    %c0_8 = arith.constant 0 : index
    %c0_9 = arith.constant 0 : index
    %12 = vector.load %arg4[%c0_8, %c0_9] : memref<32x32xf32, #tpu.memory_space<vmem>>, vector<32x32xf32>
    %cst_10 = arith.constant dense<0.000000e+00> : vector<16x32xf32>
    %13 = tpu.matmul %0, %12, %cst_10 {dimension_numbers = #tpu.dot_dimension_numbers<[1], [0], [0], [1], [0, 0, 1, 1], [], []>} : vector<16x32xf32>, vector<32x32xf32>, vector<16x32xf32> -> vector<16x32xf32>
    %14 = vector.extract_strided_slice %1 {offsets = [2, 0], sizes = [1, 32], strides = [1, 1]} : vector<16x128xf32> to vector<1x32xf32>
    %15 = vector.broadcast %14 : vector<1x32xf32> to vector<16x32xf32>
    %16 = arith.addf %13, %15 : vector<16x32xf32>
    %c0_11 = arith.constant 0 : index
    %c0_12 = arith.constant 0 : index
    %17 = vector.load %arg9[%c0_11, %c0_12] : memref<64x32xf32, #tpu.memory_space<vmem>>, vector<64x32xf32>
    %18 = tpu.concatenate %6, %6, %6, %6 in 0 : vector<16x32xf32>, vector<16x32xf32>, vector<16x32xf32>, vector<16x32xf32> -> vector<64x32xf32>
    %19 = arith.mulf %18, %17 : vector<64x32xf32>
    %cst_13 = arith.constant dense<0.000000e+00> : vector<64x16xf32>
    %20 = tpu.matmul %19, %11, %cst_13 {dimension_numbers = #tpu.dot_dimension_numbers<[1], [1], [0], [0], [0, 0, 1, 0], [], []>} : vector<64x32xf32>, vector<16x32xf32>, vector<64x16xf32> -> vector<64x16xf32>
    %c0_14 = arith.constant 0 : index
    %c0_15 = arith.constant 0 : index
    %21 = vector.load %arg10[%c0_14, %c0_15] : memref<64x16xf32, #tpu.memory_space<vmem>>, vector<64x16xf32>
    %22 = arith.addf %20, %21 : vector<64x16xf32>
    %cst_16 = arith.constant dense<0xFF800000> : vector<64xf32>
    %23 = vector.multi_reduction <maximumf>, %22, %cst_16 [1] : vector<64x16xf32> to vector<64xf32>
    %24 = vector.shape_cast %23 : vector<64xf32> to vector<64x1xf32>
    %25 = vector.broadcast %24 : vector<64x1xf32> to vector<64x16xf32>
    %26 = arith.subf %22, %25 : vector<64x16xf32>
    %27 = math.exp %26 : vector<64x16xf32>
    %cst_17 = arith.constant dense<0.000000e+00> : vector<64xf32>
    %28 = vector.multi_reduction <add>, %27, %cst_17 [1] : vector<64x16xf32> to vector<64xf32>
    %29 = vector.shape_cast %28 : vector<64xf32> to vector<64x1xf32>
    %cst_18 = arith.constant 1.000000e+00 : f32
    %30 = vector.broadcast %cst_18 : f32 to vector<64x1xf32>
    %31 = arith.divf %30, %29 : vector<64x1xf32>
    %32 = vector.broadcast %31 : vector<64x1xf32> to vector<64x16xf32>
    %33 = arith.mulf %27, %32 : vector<64x16xf32>
    %cst_19 = arith.constant dense<0.000000e+00> : vector<64x32xf32>
    %34 = tpu.matmul %33, %16, %cst_19 {dimension_numbers = #tpu.dot_dimension_numbers<[1], [0], [0], [1], [0, 0, 1, 1], [], []>} : vector<64x16xf32>, vector<16x32xf32>, vector<64x32xf32> -> vector<64x32xf32>
    %35 = arith.mulf %34, %17 : vector<64x32xf32>
    %36 = vector.extract_strided_slice %35 {offsets = [0, 0], sizes = [16, 32], strides = [1, 1]} : vector<64x32xf32> to vector<16x32xf32>
    %37 = vector.extract_strided_slice %35 {offsets = [16, 0], sizes = [16, 32], strides = [1, 1]} : vector<64x32xf32> to vector<16x32xf32>
    %38 = arith.addf %36, %37 : vector<16x32xf32>
    %39 = vector.extract_strided_slice %35 {offsets = [32, 0], sizes = [16, 32], strides = [1, 1]} : vector<64x32xf32> to vector<16x32xf32>
    %40 = arith.addf %38, %39 : vector<16x32xf32>
    %41 = vector.extract_strided_slice %35 {offsets = [48, 0], sizes = [16, 32], strides = [1, 1]} : vector<64x32xf32> to vector<16x32xf32>
    %42 = arith.addf %40, %41 : vector<16x32xf32>
    %c0_20 = arith.constant 0 : index
    %c0_21 = arith.constant 0 : index
    %43 = vector.load %arg5[%c0_20, %c0_21] : memref<32x32xf32, #tpu.memory_space<vmem>>, vector<32x32xf32>
    %cst_22 = arith.constant dense<0.000000e+00> : vector<16x32xf32>
    %44 = tpu.matmul %42, %43, %cst_22 {dimension_numbers = #tpu.dot_dimension_numbers<[1], [0], [0], [1], [0, 0, 1, 1], [], []>} : vector<16x32xf32>, vector<32x32xf32>, vector<16x32xf32> -> vector<16x32xf32>
    %45 = vector.extract_strided_slice %1 {offsets = [3, 0], sizes = [1, 32], strides = [1, 1]} : vector<16x128xf32> to vector<1x32xf32>
    %46 = vector.broadcast %45 : vector<1x32xf32> to vector<16x32xf32>
    %47 = arith.addf %44, %46 : vector<16x32xf32>
    %48 = arith.addf %0, %47 : vector<16x32xf32>
    %cst_23 = arith.constant dense<0.000000e+00> : vector<16xf32>
    %49 = vector.multi_reduction <add>, %48, %cst_23 [1] : vector<16x32xf32> to vector<16xf32>
    %50 = vector.shape_cast %49 : vector<16xf32> to vector<16x1xf32>
    %cst_24 = arith.constant 3.200000e+01 : f32
    %51 = vector.broadcast %cst_24 : f32 to vector<16x1xf32>
    %52 = arith.divf %50, %51 : vector<16x1xf32>
    %53 = arith.mulf %48, %48 : vector<16x32xf32>
    %cst_25 = arith.constant dense<0.000000e+00> : vector<16xf32>
    %54 = vector.multi_reduction <add>, %53, %cst_25 [1] : vector<16x32xf32> to vector<16xf32>
    %55 = vector.shape_cast %54 : vector<16xf32> to vector<16x1xf32>
    %cst_26 = arith.constant 3.200000e+01 : f32
    %56 = vector.broadcast %cst_26 : f32 to vector<16x1xf32>
    %57 = arith.divf %55, %56 : vector<16x1xf32>
    %58 = arith.mulf %52, %52 : vector<16x1xf32>
    %59 = arith.subf %57, %58 : vector<16x1xf32>
    %60 = vector.broadcast %52 : vector<16x1xf32> to vector<16x32xf32>
    %61 = arith.subf %48, %60 : vector<16x32xf32>
    %cst_27 = arith.constant 9.99999974E-6 : f32
    %62 = vector.broadcast %cst_27 : f32 to vector<16x1xf32>
    %63 = arith.addf %59, %62 : vector<16x1xf32>
    %64 = math.rsqrt %63 : vector<16x1xf32>
    %65 = vector.broadcast %64 : vector<16x1xf32> to vector<16x32xf32>
    %66 = arith.mulf %61, %65 : vector<16x32xf32>
    %67 = vector.extract_strided_slice %1 {offsets = [4, 0], sizes = [1, 32], strides = [1, 1]} : vector<16x128xf32> to vector<1x32xf32>
    %68 = vector.broadcast %67 : vector<1x32xf32> to vector<16x32xf32>
    %69 = arith.mulf %66, %68 : vector<16x32xf32>
    %70 = vector.extract_strided_slice %1 {offsets = [5, 0], sizes = [1, 32], strides = [1, 1]} : vector<16x128xf32> to vector<1x32xf32>
    %71 = vector.broadcast %70 : vector<1x32xf32> to vector<16x32xf32>
    %72 = arith.addf %69, %71 : vector<16x32xf32>
    %c0_28 = arith.constant 0 : index
    %c0_29 = arith.constant 0 : index
    %73 = vector.load %arg6[%c0_28, %c0_29] : memref<32x64xf32, #tpu.memory_space<vmem>>, vector<32x64xf32>
    %cst_30 = arith.constant dense<0.000000e+00> : vector<16x64xf32>
    %74 = tpu.matmul %72, %73, %cst_30 {dimension_numbers = #tpu.dot_dimension_numbers<[1], [0], [0], [1], [0, 0, 1, 1], [], []>} : vector<16x32xf32>, vector<32x64xf32>, vector<16x64xf32> -> vector<16x64xf32>
    %75 = vector.extract_strided_slice %1 {offsets = [8, 0], sizes = [1, 64], strides = [1, 1]} : vector<16x128xf32> to vector<1x64xf32>
    %76 = vector.broadcast %75 : vector<1x64xf32> to vector<16x64xf32>
    %77 = arith.addf %74, %76 : vector<16x64xf32>
    %cst_31 = arith.constant 0.000000e+00 : f32
    %78 = vector.broadcast %cst_31 : f32 to vector<16x64xf32>
    %79 = arith.maximumf %77, %78 : vector<16x64xf32>
    %c0_32 = arith.constant 0 : index
    %c0_33 = arith.constant 0 : index
    %80 = vector.load %arg7[%c0_32, %c0_33] : memref<64x32xf32, #tpu.memory_space<vmem>>, vector<64x32xf32>
    %cst_34 = arith.constant dense<0.000000e+00> : vector<16x32xf32>
    %81 = tpu.matmul %79, %80, %cst_34 {dimension_numbers = #tpu.dot_dimension_numbers<[1], [0], [0], [1], [0, 0, 1, 1], [], []>} : vector<16x64xf32>, vector<64x32xf32>, vector<16x32xf32> -> vector<16x32xf32>
    %82 = vector.extract_strided_slice %1 {offsets = [9, 0], sizes = [1, 32], strides = [1, 1]} : vector<16x128xf32> to vector<1x32xf32>
    %83 = vector.broadcast %82 : vector<1x32xf32> to vector<16x32xf32>
    %84 = arith.addf %81, %83 : vector<16x32xf32>
    %85 = arith.addf %72, %84 : vector<16x32xf32>
    %cst_35 = arith.constant dense<0.000000e+00> : vector<16xf32>
    %86 = vector.multi_reduction <add>, %85, %cst_35 [1] : vector<16x32xf32> to vector<16xf32>
    %87 = vector.shape_cast %86 : vector<16xf32> to vector<16x1xf32>
    %cst_36 = arith.constant 3.200000e+01 : f32
    %88 = vector.broadcast %cst_36 : f32 to vector<16x1xf32>
    %89 = arith.divf %87, %88 : vector<16x1xf32>
    %90 = arith.mulf %85, %85 : vector<16x32xf32>
    %cst_37 = arith.constant dense<0.000000e+00> : vector<16xf32>
    %91 = vector.multi_reduction <add>, %90, %cst_37 [1] : vector<16x32xf32> to vector<16xf32>
    %92 = vector.shape_cast %91 : vector<16xf32> to vector<16x1xf32>
    %cst_38 = arith.constant 3.200000e+01 : f32
    %93 = vector.broadcast %cst_38 : f32 to vector<16x1xf32>
    %94 = arith.divf %92, %93 : vector<16x1xf32>
    %95 = arith.mulf %89, %89 : vector<16x1xf32>
    %96 = arith.subf %94, %95 : vector<16x1xf32>
    %97 = vector.broadcast %89 : vector<16x1xf32> to vector<16x32xf32>
    %98 = arith.subf %85, %97 : vector<16x32xf32>
    %cst_39 = arith.constant 9.99999974E-6 : f32
    %99 = vector.broadcast %cst_39 : f32 to vector<16x1xf32>
    %100 = arith.addf %96, %99 : vector<16x1xf32>
    %101 = math.rsqrt %100 : vector<16x1xf32>
    %102 = vector.broadcast %101 : vector<16x1xf32> to vector<16x32xf32>
    %103 = arith.mulf %98, %102 : vector<16x32xf32>
    %104 = vector.extract_strided_slice %1 {offsets = [6, 0], sizes = [1, 32], strides = [1, 1]} : vector<16x128xf32> to vector<1x32xf32>
    %105 = vector.broadcast %104 : vector<1x32xf32> to vector<16x32xf32>
    %106 = arith.mulf %103, %105 : vector<16x32xf32>
    %107 = vector.extract_strided_slice %1 {offsets = [7, 0], sizes = [1, 32], strides = [1, 1]} : vector<16x128xf32> to vector<1x32xf32>
    %108 = vector.broadcast %107 : vector<1x32xf32> to vector<16x32xf32>
    %109 = arith.addf %106, %108 : vector<16x32xf32>
    %c0_40 = arith.constant 0 : index
    %c0_41 = arith.constant 0 : index
    %110 = vector.load %arg11[%c0_40, %c0_41] : memref<16x32xf32, #tpu.memory_space<vmem>>, vector<16x32xf32>
    tpu.vector_store %arg11[%c0_40, %c0_41], %109 {strides = array<i32>} : memref<16x32xf32, #tpu.memory_space<vmem>>, vector<16x32xf32>,
    return
  }
  func.func @transform_0(%arg0: i32) -> (i32, i32) {
    %c0_i32 = arith.constant 0 : i32
    %c0_i32_0 = arith.constant 0 : i32
    return %arg0, %c0_i32 : i32, i32
  }
  func.func @transform_1(%arg0: i32) -> (i32, i32) {
    %c0_i32 = arith.constant 0 : i32
    %c0_i32_0 = arith.constant 0 : i32
    %c0_i32_1 = arith.constant 0 : i32
    return %c0_i32, %c0_i32_0 : i32, i32
  }
  func.func @transform_2(%arg0: i32) -> (i32, i32) {
    %c0_i32 = arith.constant 0 : i32
    %c0_i32_0 = arith.constant 0 : i32
    %c0_i32_1 = arith.constant 0 : i32
    return %c0_i32, %c0_i32_0 : i32, i32
  }
  func.func @transform_3(%arg0: i32) -> (i32, i32) {
    %c0_i32 = arith.constant 0 : i32
    %c0_i32_0 = arith.constant 0 : i32
    %c0_i32_1 = arith.constant 0 : i32
    return %c0_i32, %c0_i32_0 : i32, i32
  }
  func.func @transform_4(%arg0: i32) -> (i32, i32) {
    %c0_i32 = arith.constant 0 : i32
    %c0_i32_0 = arith.constant 0 : i32
    %c0_i32_1 = arith.constant 0 : i32
    return %c0_i32, %c0_i32_0 : i32, i32
  }
  func.func @transform_5(%arg0: i32) -> (i32, i32) {
    %c0_i32 = arith.constant 0 : i32
    %c0_i32_0 = arith.constant 0 : i32
    %c0_i32_1 = arith.constant 0 : i32
    return %c0_i32, %c0_i32_0 : i32, i32
  }
  func.func @transform_6(%arg0: i32) -> (i32, i32) {
    %c0_i32 = arith.constant 0 : i32
    %c0_i32_0 = arith.constant 0 : i32
    %c0_i32_1 = arith.constant 0 : i32
    return %c0_i32, %c0_i32_0 : i32, i32
  }
  func.func @transform_7(%arg0: i32) -> (i32, i32) {
    %c0_i32 = arith.constant 0 : i32
    %c0_i32_0 = arith.constant 0 : i32
    %c0_i32_1 = arith.constant 0 : i32
    return %c0_i32, %c0_i32_0 : i32, i32
  }
  func.func @transform_8(%arg0: i32) -> (i32, i32) {
    %c0_i32 = arith.constant 0 : i32
    %c0_i32_0 = arith.constant 0 : i32
    %c0_i32_1 = arith.constant 0 : i32
    return %c0_i32, %c0_i32_0 : i32, i32
  }
  func.func @transform_9(%arg0: i32) -> (i32, i32) {
    %c0_i32 = arith.constant 0 : i32
    %c0_i32_0 = arith.constant 0 : i32
    %c0_i32_1 = arith.constant 0 : i32
    return %c0_i32, %c0_i32_0 : i32, i32
  }
  func.func @transform_10(%arg0: i32) -> (i32, i32) {
    %c0_i32 = arith.constant 0 : i32
    %c0_i32_0 = arith.constant 0 : i32
    return %arg0, %c0_i32 : i32, i32
  }
}

</mosaic_0001>

<bundles_post_ra>
// kernel: tpu_custom_call.1
= control target key start
LH: loop header
LB: loop body
LE: loop exit
PB: predicated region body
PF: predicated region fallthrough
CT: control target
= control target key end

     0   :  { %vm48_vm0 = vcmask 261120   ;;  %s1745_s0 = inlined_call_operand.vmem [shape: f32[16,32], index: 0, kind: input, shape index: {}]   ;;  %s1746_s1 = inlined_call_operand.vmem [shape: f32[32,32], index: 1, kind: input, shape index: {}]   ;;  %s1747_s2 = inlined_call_operand.vmem [shape: f32[32,32], index: 2, kind: input, shape index: {}]   ;;  %s1748_s3 = inlined_call_operand.vmem [shape: f32[32,32], index: 3, kind: input, shape index: {}]   ;;  %s1749_s4 = inlined_call_operand.vmem [shape: f32[32,32], index: 4, kind: input, shape index: {}]   ;;  %s1750_s5 = inlined_call_operand.vmem [shape: f32[32,64], index: 5, kind: input, shape index: {}]   ;;  %s1751_s6 = inlined_call_operand.vmem [shape: f32[64,32], index: 6, kind: input, shape index: {}]   ;;  %s1752_s7 = inlined_call_operand.vmem [shape: f32[16,128], index: 7, kind: input, shape index: {}]   ;;  %s1753_s8 = inlined_call_operand.vmem [shape: f32[64,32], index: 8, kind: input, shape index: {}]   ;;  %s1754_s9 = inlined_call_operand.vmem [shape: f32[64,16], index: 9, kind: input, shape index: {}]   ;;  %s1755_s10 = inlined_call_operand.hbm [shape: f32[16,32], index: 10, kind: output, shape index: {}]  }
   0x1   :  { %v40_v0 = vld [vmem:[%s1746_s1] sm:$0xff]  ;;  %v41_v1 = vld [vmem:[%s1746_s1 + $0x8] sm:$0xff]  ;;  %v42_v2 = vld [vmem:[%s1746_s1 + $0x10] sm:$0xff] }
   0x2   :  { %v1272_v3 = vpack.c.bf16 %v41_v1, %v40_v0  ;;  %v43_v4 = vld [vmem:[%s1746_s1 + $0x18] sm:$0xff]  ;;  %v1478_v5 = vld [vmem:[%s1745_s0] sm:$0xff]  ;;  %v131_v8 = vld [vmem:[%s1747_s2 + $0x8] sm:$0xff] }
   0x3   :  { %v1276_v6 = vpack.c.bf16 %v43_v4, %v42_v2  ;;  %1174 = vmatprep.mubr.msk.f32.mxu0 %vm48_vm0, %v1478_v5  ;;  %v130_v7 = vld [vmem:[%s1747_s2] sm:$0xff] }
   0x4   :  { %1273 = vmatprep.subr.bf16.mxu0 %v1272_v3 }
   0x5   :  { %15 = vsyncpa [#allocation3], 0  ;;  %1275 = vmatpush3.bf16.msra.mxu0 %v1272_v3  ;;  %v1280_v9 = vpack.c.bf16 %v131_v8, %v130_v7  ;;  %v132_v10 = vld [vmem:[%s1747_s2 + $0x10] sm:$0xff]  ;;  %v133_v11 = vld [vmem:[%s1747_s2 + $0x18] sm:$0xff]  ;;  %v44_v14 = vlaneseq  ;;  %vm455_vm2 = vcmask 130048   ;;  %vm932_vm3 = vcmask 523264  }
   0x6   :  { %1277 = vmatprep.subr.bf16.mxu0 %v1276_v6  ;;  %v1497_v12 = vld [vmem:[%s1745_s0 + $0x8] sm:$0xff]  ;;  %v1284_v13 = vpack.c.bf16 %v133_v11, %v132_v10  ;;  %v1513_v17 = vld [vmem:[%s1752_s7] sm:$0xff]  ;;  %vm1297_vm1 = vmpackc.low %vm48_vm0, %vm48_vm0 }
   0x7   :  { %v1507_v15 = vshrl.u32 %v44_v14, 7  ;;  %v1521_v21 = vld [vmem:[%s1753_s8] sm:$0xff]  ;;  %v1534_v32 = vld [vmem:[%s1753_s8 + $0x8] sm:$0xff]  ;;  %v1539_v33 = vld [vmem:[%s1753_s8 + $0x10] sm:$0xff] }
   0x8   :  { %v1546_v36 = vld [vmem:[%s1753_s8 + $0x18] sm:$0xff]  ;;  %v1552_v37 = vld [vmem:[%s1753_s8 + $0x20] sm:$0xff]  ;;  %v1560_v40 = vld [vmem:[%s1753_s8 + $0x28] sm:$0xff] }
   0x9   :  { %1279 = vmatpush3.bf16.msra.mxu0 %v1276_v6  ;;  %v46_v16 = vsub.s32 0, %v1507_v15  ;;  %v136_v22 = vsub.s32 1, %v1507_v15  ;;  %v1566_v41 = vld [vmem:[%s1753_s8 + $0x30] sm:$0xff]  ;;  %v1574_v44 = vld [vmem:[%s1753_s8 + $0x38] sm:$0xff]  ;;  %v213_v46 = vld [vmem:[%s1748_s3] sm:$0xff] }
   0xa   :  { %1281 = vmatprep.subr.bf16.mxu0 %v1280_v9  ;;  %v214_v47 = vld [vmem:[%s1748_s3 + $0x8] sm:$0xff]  ;;  %v215_v48 = vld [vmem:[%s1748_s3 + $0x10] sm:$0xff]  ;;  %v216_v50 = vld [vmem:[%s1748_s3 + $0x18] sm:$0xff] }
   0xb   :  { %v47_v18 = vrot.slane %v1513_v17, %v46_v16  ;;  %v137_v25 = vrot.slane %v1513_v17, %v136_v22  ;;  %v1288_v49 = vpack.c.bf16 %v214_v47, %v213_v46  ;;  %v1292_v51 = vpack.c.bf16 %v216_v50, %v215_v48  ;;  %v312_v52 = vld [vmem:[%s1754_s9] sm:$0xff]  ;;  %v313_v54 = vld [vmem:[%s1754_s9 + $0x8] sm:$0xff]  ;;  %v314_v57 = vld [vmem:[%s1754_s9 + $0x10] sm:$0xff] }
   0xc   :  { %1175 = vmatmul.mubr.msk.f32.vlgmr.msra.gmra.mrb[0].mxu0 %vm48_vm0, %v1497_v12  ;;  %v315_v61 = vld [vmem:[%s1754_s9 + $0x18] sm:$0xff]  ;;  %v316_v0 = vld [vmem:[%s1754_s9 + $0x20] sm:$0xff]  ;;  %v317_v6 = vld [vmem:[%s1754_s9 + $0x28] sm:$0xff] }
   0xd   :  { %1283 = vmatpush3.bf16.msra.mxu0 %v1280_v9  ;;  %1185 = vmatprep.mubr.msk.f32.mxu0 %vm48_vm0, %v1478_v5  ;;  %v318_v9 = vld [vmem:[%s1754_s9 + $0x30] sm:$0xff] }
   0xe   :  { %1285 = vmatprep.subr.bf16.mxu0 %v1284_v13 }
  0x11   :  { %1287 = vmatpush3.bf16.msra.mxu0 %v1284_v13 }
  0x12   :  { %1289 = vmatprep.subr.bf16.mxu0 %v1288_v49 }
  0x14   :  { %1186 = vmatmul.mubr.msk.f32.vlgmr.msra.gmra.mrb[2].mxu0 %vm48_vm0, %v1497_v12 }
  0x15   :  { %1196 = vmatprep.mubr.msk.f32.mxu0 %vm48_vm0, %v1478_v5  ;;  %1291 = vmatpush3.bf16.msra.mxu0 %v1288_v49 }
  0x16   :  { %1293 = vmatprep.subr.bf16.mxu0 %v1292_v51 }
  0x19   :  { %1295 = vmatpush3.bf16.msra.mxu0 %v1292_v51 }
  0x1c   :  { %1197 = vmatmul.mubr.msk.f32.vlgmr.msra.gmra.mrb[4].mxu0 %vm48_vm0, %v1497_v12 }
  0xdf   :  { %v1176_v19 = vpop.f32.mrb[0].mxu0 }
  0xe0   :  { %v121_v20 = vpop.f32.mrb[1].mxu0  ;;  %v127_v31 = vadd.f32 %v1176_v19, %v47_v18 }
  0xe1   :  { %v122_v23 = vadd.f32 %v121_v20, %v47_v18  ;;  %v319_v18 = vld [vmem:[%s1754_s9 + $0x38] sm:$0xff] }
  0xe2   :  { %v305_v34 = vmul.f32 %v1534_v32, %v127_v31  ;;  %v307_v38 = vmul.f32 %v1546_v36, %v127_v31  ;;  %v309_v42 = vmul.f32 %v1560_v40, %v127_v31  ;;  %v311_v45 = vmul.f32 %v1574_v44, %v127_v31 }
  0xe3   :  { %v304_v24 = vmul.f32 %v1521_v21, %v122_v23  ;;  %v306_v35 = vmul.f32 %v1539_v33, %v122_v23  ;;  %v308_v39 = vmul.f32 %v1552_v37, %v122_v23  ;;  %v310_v43 = vmul.f32 %v1566_v41, %v122_v23 }
  0xe5   :  { %1203 = vmatprep.mubr.msk.f32.mxu1 %vm48_vm0, %v304_v24 }
  0xe7   :  { %v1187_v26 = vpop.f32.mrb[2].mxu0 }
  0xe8   :  { %v210_v27 = vadd.f32 %v1187_v26, %v137_v25  ;;  %v204_v28 = vpop.f32.mrb[3].mxu0 }
  0xe9   :  { %v205_v29 = vadd.f32 %v204_v28, %v137_v25 }
  0xeb   :  { %v1296_v30 = vpack.c.bf16 %v210_v27, %v205_v29 }
  0xed   :  { %1298 = vmatprep.subr.msk.bf16.mxu1 %vm1297_vm1, %v1296_v30 }
  0xee   :  { %1301 = vmatpush3.bf16.xpose.msk.msra.mxu1 %vm1297_vm1, %v1296_v30 }
  0xf5   :  { %1204 = vmatmul.mubr.msk.f32.vlgmr.msra.gmra.mrb[0].mxu1 %vm48_vm0, %v305_v34 }
  0xf6   :  { %1206 = vmatprep.mubr.msk.f32.mxu1 %vm48_vm0, %v306_v35 }
  0xf9   :  { %1207 = vmatmul.mubr.msk.f32.gmra.mrb[2].mxu1 %vm48_vm0, %v307_v38 }
  0xfa   :  { %1209 = vmatprep.mubr.msk.f32.mxu1 %vm48_vm0, %v308_v39 }
  0xfd   :  { %1210 = vmatmul.mubr.msk.f32.gmra.mrb[4].mxu1 %vm48_vm0, %v309_v42 }
  0xfe   :  { %1212 = vmatprep.mubr.msk.f32.mxu1 %vm48_vm0, %v310_v43 }
 0x101   :  { %1213 = vmatmul.mubr.msk.f32.gmra.mrb[6].mxu1 %vm48_vm0, %v311_v45 }
 0x1c8   :  { %v1205_v53 = vpop.f32.mrb[0].mxu1 }
 0x1c9   :  { %v416_v55 = vpop.f32.mrb[1].mxu1  ;;  %v422_v58 = vadd.f32 %v1205_v53, %v313_v54 }
 0x1ca   :  { %v417_v56 = vadd.f32 %v416_v55, %v312_v52 }
 0x1cb   :  { %v459_v4 = vsel %vm455_vm2, %v422_v58, -inf }
 0x1cc   :  { %v1208_v59 = vpop.f32.mrb[2].mxu1  ;;  %v456_v60 = vsel %vm455_vm2, %v417_v56, -inf }
 0x1cd   :  { %v426_v62 = vpop.f32.mrb[3].mxu1  ;;  %457 = vmax.xlane.f32.xlu0 %v456_v60  ;;  %v432_v1 = vadd.f32 %v1208_v59, %v315_v61 }
 0x1ce   :  { %v427_v63 = vadd.f32 %v426_v62, %v314_v57 }
 0x1cf   :  { %v465_v13 = vsel %vm455_vm2, %v432_v1, -inf }
 0x1d0   :  { %v1211_v2 = vpop.f32.mrb[4].mxu1  ;;  %v462_v3 = vsel %vm455_vm2, %v427_v63, -inf }
 0x1d1   :  { %v436_v7 = vpop.f32.mrb[5].mxu1  ;;  %463 = vmax.xlane.f32.xlu1 %v462_v3  ;;  %460 = vmax.xlane.f32.xlu0 %v459_v4  ;;  %v442_v10 = vadd.f32 %v1211_v2, %v317_v6 }
 0x1d2   :  { %v437_v8 = vadd.f32 %v436_v7, %v316_v0 }
 0x1d3   :  { %v471_v24 = vsel %vm455_vm2, %v442_v10, -inf }
 0x1d4   :  { %v1214_v11 = vpop.f32.mrb[6].mxu1  ;;  %v468_v14 = vsel %vm455_vm2, %v437_v8, -inf }
 0x1d5   :  { %v446_v19 = vpop.f32.mrb[7].mxu1  ;;  %466 = vmax.xlane.f32.xlu1 %v465_v13  ;;  %469 = vmax.xlane.f32.xlu0 %v468_v14  ;;  %v452_v23 = vadd.f32 %v1214_v11, %v319_v18  ;;  %v219_v11 = vsub.s32 2, %v1507_v15  ;;  %v1198_v14 = vpop.f32.mrb[4].mxu0 }
 0x1d6   :  { %v447_v20 = vadd.f32 %v446_v19, %v318_v9  ;;  %v287_v18 = vpop.f32.mrb[5].mxu0 }
 0x1d7   :  { %v477_v26 = vsel %vm455_vm2, %v452_v23, -inf  ;;  %v220_v13 = vrot.slane %v1513_v17, %v219_v11 }
 0x1d8   :  { %v474_v25 = vsel %vm455_vm2, %v447_v20, -inf }
 0x1d9   :  { %472 = vmax.xlane.f32.xlu1 %v471_v24  ;;  %475 = vmax.xlane.f32.xlu0 %v474_v25  ;;  %v293_v19 = vadd.f32 %v1198_v14, %v220_v13 }
 0x1dd   :  { %478 = vmax.xlane.f32.xlu1 %v477_v26 }
 0x25a   :  { %v458_v27 = vpop.xlane.xlu0 %457 }
 0x25b   :  { %v480_v28 = vsub.f32 %v417_v56, %v458_v27 }
 0x25d   :  { %v488_v29 = vmul.f32 1.442695, %v480_v28 }
 0x25e   :  { %v464_v30 = vpop.xlane.xlu1 %463  ;;  %v461_v31 = vpop.xlane.xlu0 %460 }
 0x25f   :  { %1341 = vpow2.f32 %v488_v29  ;;  %v482_v34 = vsub.f32 %v427_v63, %v464_v30  ;;  %v481_v35 = vsub.f32 %v422_v58, %v461_v31 }
 0x261   :  { %v492_v38 = vmul.f32 1.442695, %v482_v34  ;;  %v490_v39 = vmul.f32 1.442695, %v481_v35 }
 0x262   :  { %v467_v42 = vpop.xlane.xlu1 %466  ;;  %v470_v43 = vpop.xlane.xlu0 %469 }
 0x263   :  { %1343 = vpow2.f32 %v492_v38  ;;  %v483_v45 = vsub.f32 %v432_v1, %v467_v42  ;;  %v484_v46 = vsub.f32 %v437_v8, %v470_v43 }
 0x264   :  { %1345 = vpow2.f32 %v490_v39 }
 0x265   :  { %v494_v47 = vmul.f32 1.442695, %v483_v45  ;;  %v496_v48 = vmul.f32 1.442695, %v484_v46 }
 0x266   :  { %v473_v49 = vpop.xlane.xlu1 %472  ;;  %v476_v50 = vpop.xlane.xlu0 %475 }
 0x267   :  { %1347 = vpow2.f32 %v494_v47  ;;  %v485_v51 = vsub.f32 %v442_v10, %v473_v49  ;;  %v486_v52 = vsub.f32 %v447_v20, %v476_v50  ;;  %v288_v20 = vadd.f32 %v287_v18, %v220_v13 }
 0x268   :  { %1349 = vpow2.f32 %v496_v48 }
 0x269   :  { %v1342_v53 = vpop.eup %1341  ;;  %v498_v54 = vmul.f32 1.442695, %v485_v51  ;;  %v500_v55 = vmul.f32 1.442695, %v486_v52 }
 0x26a   :  { %v479_v56 = vpop.xlane.xlu1 %478  ;;  %v504_v57 = vsel %vm455_vm2, %v1342_v53, 0.0 }
 0x26b   :  { %1351 = vpow2.f32 %v498_v54  ;;  %v487_v58 = vsub.f32 %v452_v23, %v479_v56  ;;  %505 = vadd.xlane.f32.xlu0 %v504_v57  ;;  %v1302_v23 = vpack.c.bf16 %v293_v19, %v288_v20  ;;  %v696_v56 = vld [vmem:[%s1749_s4 + $0x8] sm:$0xff] }
 0x26c   :  { %1353 = vpow2.f32 %v500_v55  ;;  %v695_v55 = vld [vmem:[%s1749_s4] sm:$0xff] }
 0x26d   :  { %v1344_v59 = vpop.eup %1343  ;;  %v502_v60 = vmul.f32 1.442695, %v487_v58  ;;  %1303 = vmatprep.subr.bf16.mxu0 %v1302_v23  ;;  %v1306_v57 = vpack.c.bf16 %v696_v56, %v695_v55  ;;  %v697_v58 = vld [vmem:[%s1749_s4 + $0x10] sm:$0xff] }
 0x26e   :  { %v1346_v61 = vpop.eup %1345  ;;  %v510_v62 = vsel %vm455_vm2, %v1344_v59, 0.0  ;;  %1305 = vmatpush3.bf16.msra.mxu0 %v1302_v23 }
 0x26f   :  { %1355 = vpow2.f32 %v502_v60  ;;  %511 = vadd.xlane.f32.xlu0 %v510_v62  ;;  %v507_v63 = vsel %vm455_vm2, %v1346_v61, 0.0  ;;  %1307 = vmatprep.subr.bf16.mxu1 %v1306_v57 }
 0x270   :  { %508 = vadd.xlane.f32.xlu1 %v507_v63  ;;  %1309 = vmatpush3.bf16.msra.mxu1 %v1306_v57 }
 0x271   :  { %v1348_v0 = vpop.eup %1347 }
 0x272   :  { %v1350_v1 = vpop.eup %1349  ;;  %v513_v2 = vsel %vm455_vm2, %v1348_v0, 0.0 }
 0x273   :  { %v516_v3 = vsel %vm455_vm2, %v1350_v1, 0.0 }
 0x274   :  { %514 = vadd.xlane.f32.xlu1 %v513_v2  ;;  %517 = vadd.xlane.f32.xlu0 %v516_v3 }
 0x275   :  { %v1352_v4 = vpop.eup %1351 }
 0x276   :  { %v1354_v6 = vpop.eup %1353  ;;  %v519_v7 = vsel %vm455_vm2, %v1352_v4, 0.0 }
 0x277   :  { %v522_v8 = vsel %vm455_vm2, %v1354_v6, 0.0 }
 0x278   :  { %520 = vadd.xlane.f32.xlu1 %v519_v7  ;;  %523 = vadd.xlane.f32.xlu0 %v522_v8 }
 0x279   :  { %v1356_v9 = vpop.eup %1355 }
 0x27a   :  { %v525_v10 = vsel %vm455_vm2, %v1356_v9, 0.0 }
 0x27c   :  { %526 = vadd.xlane.f32.xlu1 %v525_v10 }
 0x2f8   :  { %v506_v24 = vpop.xlane.xlu0 %505 }
 0x2f9   :  { %1357 = vrcp.f32 %v506_v24 }
 0x2fc   :  { %v512_v25 = vpop.xlane.xlu0 %511 }
 0x2fd   :  { %v509_v26 = vpop.xlane.xlu1 %508  ;;  %1359 = vrcp.f32 %v512_v25 }
 0x2fe   :  { %1361 = vrcp.f32 %v509_v26 }
 0x301   :  { %v515_v27 = vpop.xlane.xlu1 %514  ;;  %v518_v28 = vpop.xlane.xlu0 %517 }
 0x302   :  { %1363 = vrcp.f32 %v515_v27 }
 0x303   :  { %v1358_v29 = vpop.eup %1357  ;;  %1365 = vrcp.f32 %v518_v28 }
 0x304   :  { %v544_v30 = vmul.f32 %v1358_v29, %v1342_v53 }
 0x305   :  { %v521_v31 = vpop.xlane.xlu1 %520  ;;  %v524_v34 = vpop.xlane.xlu0 %523 }
 0x306   :  { %1367 = vrcp.f32 %v521_v31  ;;  %1219 = vmatprep.mubr.msk.f32.mxu0 %vm455_vm2, %v544_v30 }
 0x307   :  { %v1360_v35 = vpop.eup %1359  ;;  %1369 = vrcp.f32 %v524_v34 }
 0x308   :  { %v1362_v38 = vpop.eup %1361  ;;  %v546_v39 = vmul.f32 %v1360_v35, %v1344_v59  ;;  %v698_v59 = vld [vmem:[%s1749_s4 + $0x18] sm:$0xff]  ;;  %v831_v35 = vld [vmem:[%s1750_s5 + $0x10] sm:$0xff] }
 0x309   :  { %v545_v42 = vmul.f32 %v1362_v38, %v1346_v61  ;;  %v527_v43 = vpop.xlane.xlu1 %526  ;;  %v1310_v60 = vpack.c.bf16 %v698_v59, %v697_v58  ;;  %v832_v38 = vld [vmem:[%s1750_s5 + $0x18] sm:$0xff] }
 0x30a   :  { %1371 = vrcp.f32 %v527_v43  ;;  %v921_v43 = vld [vmem:[%s1751_s6 + $0x8] sm:$0xff] }
 0x30b   :  { %1220 = vmatmul.mubr.msk.f32.vlgmr.msra.gmra.mrb[6].mxu0 %vm455_vm2, %v545_v42  ;;  %1311 = vmatprep.subr.bf16.mxu1 %v1310_v60  ;;  %v920_v42 = vld [vmem:[%s1751_s6] sm:$0xff] }
 0x30c   :  { %v1364_v45 = vpop.eup %1363  ;;  %1222 = vmatprep.mubr.msk.f32.mxu0 %vm455_vm2, %v546_v39  ;;  %1313 = vmatpush3.bf16.msra.mxu1 %v1310_v60  ;;  %v1318_v39 = vpack.c.bf16 %v832_v38, %v831_v35 }
 0x30d   :  { %v1366_v46 = vpop.eup %1365  ;;  %v547_v47 = vmul.f32 %v1364_v45, %v1348_v0  ;;  %v922_v45 = vld [vmem:[%s1751_s6 + $0x10] sm:$0xff] }
 0x30e   :  { %v548_v48 = vmul.f32 %v1366_v46, %v1350_v1  ;;  %v1322_v46 = vpack.c.bf16 %v921_v43, %v920_v42 }
 0x30f   :  { %1223 = vmatmul.mubr.msk.f32.gmra.mrb[8].mxu0 %vm455_vm2, %v547_v47  ;;  %v923_v47 = vld [vmem:[%s1751_s6 + $0x18] sm:$0xff] }
 0x310   :  { %v1368_v49 = vpop.eup %1367  ;;  %1225 = vmatprep.mubr.msk.f32.mxu0 %vm455_vm2, %v548_v48  ;;  %v1326_v48 = vpack.c.bf16 %v923_v47, %v922_v45  ;;  %1323 = vmatprep.subr.bf16.mxu1 %v1322_v46 }
 0x311   :  { %v1370_v50 = vpop.eup %1369  ;;  %v549_v51 = vmul.f32 %v1368_v49, %v1352_v4  ;;  %v924_v49 = vld [vmem:[%s1751_s6 + $0x20] sm:$0xff] }
 0x312   :  { %v550_v52 = vmul.f32 %v1370_v50, %v1354_v6  ;;  %v925_v50 = vld [vmem:[%s1751_s6 + $0x28] sm:$0xff] }
 0x313   :  { %1226 = vmatmul.mubr.msk.f32.gmra.mrb[10].mxu0 %vm455_vm2, %v549_v51  ;;  %v1330_v51 = vpack.c.bf16 %v925_v50, %v924_v49 }
 0x314   :  { %v1372_v53 = vpop.eup %1371  ;;  %1228 = vmatprep.mubr.msk.f32.mxu0 %vm455_vm2, %v550_v52 }
 0x315   :  { %v551_v54 = vmul.f32 %v1372_v53, %v1356_v9 }
 0x317   :  { %1229 = vmatmul.mubr.msk.f32.gmra.mrb[12].mxu0 %vm455_vm2, %v551_v54 }
 0x3de   :  { %v1221_v61 = vpop.f32.mrb[6].mxu0 }
 0x3df   :  { %v642_v62 = vpop.f32.mrb[7].mxu0  ;;  %v682_v0 = vmul.f32 %v1221_v61, %v1534_v32 }
 0x3e0   :  { %v681_v3 = vmul.f32 %v642_v62, %v1521_v21 }
 0x3e2   :  { %v1224_v63 = vpop.f32.mrb[8].mxu0 }
 0x3e3   :  { %v684_v1 = vmul.f32 %v1224_v63, %v1546_v36  ;;  %v652_v2 = vpop.f32.mrb[9].mxu0 }
 0x3e4   :  { %v683_v4 = vmul.f32 %v652_v2, %v1539_v33  ;;  %v701_v33 = vsub.s32 3, %v1507_v15  ;;  %v819_v2 = vsub.s32 4, %v1507_v15 }
 0x3e5   :  { %v690_v6 = vadd.f32 %v684_v1, %v682_v0 }
 0x3e6   :  { %v689_v7 = vadd.f32 %v683_v4, %v681_v3  ;;  %v1227_v8 = vpop.f32.mrb[10].mxu0  ;;  %v825_v3 = vsub.s32 5, %v1507_v15 }
 0x3e7   :  { %v686_v9 = vmul.f32 %v1227_v8, %v1560_v40  ;;  %v662_v10 = vpop.f32.mrb[11].mxu0  ;;  %v702_v40 = vrot.slane %v1513_v17, %v701_v33  ;;  %v39_v33 = vld [vmem:[%s1752_s7 + $0x8] sm:$0xff] }
 0x3e8   :  { %v685_v11 = vmul.f32 %v662_v10, %v1552_v37 }
 0x3e9   :  { %v692_v13 = vadd.f32 %v690_v6, %v686_v9  ;;  %v820_v6 = vrot.slane %v1513_v17, %v819_v2 }
 0x3ea   :  { %v691_v14 = vadd.f32 %v689_v7, %v685_v11  ;;  %v1230_v18 = vpop.f32.mrb[12].mxu0 }
 0x3eb   :  { %v688_v32 = vmul.f32 %v1230_v18, %v1574_v44  ;;  %v672_v19 = vpop.f32.mrb[13].mxu0 }
 0x3ec   :  { %v687_v36 = vmul.f32 %v672_v19, %v1566_v41 }
 0x3ed   :  { %v694_v20 = vadd.f32 %v692_v13, %v688_v32  ;;  %v826_v13 = vrot.slane %v1513_v17, %v825_v3 }
 0x3ee   :  { %v693_v21 = vadd.f32 %v691_v14, %v687_v36  ;;  %v926_v36 = vld [vmem:[%s1751_s6 + $0x30] sm:$0xff] }
 0x3f0   :  { %1239 = vmatprep.mubr.msk.f32.mxu1 %vm48_vm0, %v693_v21 }
 0x3f1   :  { %1240 = vmatmul.mubr.msk.f32.vlgmr.msra.gmra.mrb[8].mxu1 %vm48_vm0, %v694_v20  ;;  %v927_v20 = vld [vmem:[%s1751_s6 + $0x38] sm:$0xff]  ;;  %s1405_s6 = smov [#allocation2]  }
 0x3f2   :  { %1325 = vmatpush3.bf16.msra.mxu1 %v1322_v46  ;;  %v1334_v21 = vpack.c.bf16 %v927_v20, %v926_v36  ;;  %s1065_s7 = sshll.u32 %s1405_s6, 4  ;;  %s1066_s7 = int_to_ptr.vmem [resolvable:$true] %s1065_s7 }
 0x3f3   :  { %1327 = vmatprep.subr.bf16.mxu1 %v1326_v48  ;;  %s1381_s11 = scalar_lea.vmem %s1066_s7, 256  ;;  %p1386_p1 = scmp.lt.s32.totalorder %s1066_s7, %s1066_s7 }
 0x3f4   :  { %p1382_p0 = scmp.ne.s32.totalorder %s1066_s7, %s1381_s11  ;;  %p1387_p2 = scmp.lt.s32.totalorder %s1381_s11, %s1381_s11 }
 0x3f6   :  { %1329 = vmatpush3.bf16.msra.mxu1 %v1326_v48  ;;  %p1388_p3 = por %p1387_p2, %p1386_p1 }
 0x3f7   :  { %1331 = vmatprep.subr.bf16.mxu1 %v1330_v51 }
 0x3f8   :  { %p1389_p4 = pnand %p1388_p3, %p1382_p0 }
 0x3fa   :  { %1333 = vmatpush3.bf16.msra.mxu1 %v1330_v51 }
 0x3fb   :  { %1335 = vmatprep.subr.bf16.mxu1 %v1334_v21 }
 0x3fe   :  { %1337 = vmatpush3.bf16.msra.mxu1 %v1334_v21 }
 0x4c4   :  { %v1241_v23 = vpop.f32.mrb[8].mxu1 }
 0x4c5   :  { %v781_v37 = vadd.f32 %v1241_v23, %v702_v40  ;;  %v775_v24 = vpop.f32.mrb[9].mxu1 }
 0x4c6   :  { %v776_v25 = vadd.f32 %v775_v24, %v702_v40  ;;  %v836_v40 = vrot.slane %v39_v33, %v46_v16 }
 0x4c7   :  { %v785_v26 = vadd.f32 %v781_v37, %v1497_v12  ;;  %v829_v12 = vld [vmem:[%s1750_s5] sm:$0xff] }
 0x4c8   :  { %v784_v44 = vadd.f32 %v776_v25, %v1478_v5  ;;  %v830_v5 = vld [vmem:[%s1750_s5 + $0x8] sm:$0xff] }
 0x4c9   :  { %v789_v41 = vsel %vm48_vm0, %v785_v26, 0.0  ;;  %v796_v27 = vmul.f32 %v785_v26, %v785_v26  ;;  %v1314_v34 = vpack.c.bf16 %v830_v5, %v829_v12 }
 0x4ca   :  { %790 = vadd.xlane.f32.xlu1 %v789_v41  ;;  %v786_v28 = vsel %vm48_vm0, %v784_v44, 0.0  ;;  %v795_v29 = vmul.f32 %v784_v44, %v784_v44  ;;  %v931_v41 = vrot.slane %v39_v33, %v136_v22 }
 0x4cb   :  { %787 = vadd.xlane.f32.xlu0 %v786_v28  ;;  %v800_v30 = vsel %vm48_vm0, %v796_v27, 0.0  ;;  %1315 = vmatprep.subr.bf16.mxu0 %v1314_v34 }
 0x4cc   :  { %v797_v31 = vsel %vm48_vm0, %v795_v29, 0.0  ;;  %1317 = vmatpush3.bf16.msra.mxu0 %v1314_v34 }
 0x4cd   :  { %1319 = vmatprep.subr.bf16.mxu0 %v1318_v39 }
 0x4ce   :  { %801 = vadd.xlane.f32.xlu1 %v800_v30 }
 0x4cf   :  { %798 = vadd.xlane.f32.xlu0 %v797_v31 }
 0x4d0   :  { %1321 = vmatpush3.bf16.msra.mxu0 %v1318_v39 }
 0x557   :  { %v791_v52 = vpop.xlane.xlu1 %790 }
 0x558   :  { %v794_v53 = vmul.f32 0.03125, %v791_v52  ;;  %v788_v54 = vpop.xlane.xlu0 %787 }
 0x559   :  { %v793_v55 = vmul.f32 0.03125, %v788_v54 }
 0x55a   :  { %v806_v57 = vmul.f32 %v794_v53, %v794_v53  ;;  %v810_v4 = vsub.f32 %v785_v26, %v794_v53 }
 0x55b   :  { %v802_v56 = vpop.xlane.xlu1 %801  ;;  %v805_v60 = vmul.f32 %v793_v55, %v793_v55  ;;  %v809_v8 = vsub.f32 %v784_v44, %v793_v55 }
 0x55c   :  { %v804_v58 = vmul.f32 0.03125, %v802_v56  ;;  %v799_v59 = vpop.xlane.xlu0 %798  ;;  %v1048_v56 = vsub.s32 6, %v1507_v15 }
 0x55d   :  { %v803_v61 = vmul.f32 0.03125, %v799_v59 }
 0x55e   :  { %v808_v62 = vsub.f32 %v804_v58, %v806_v57  ;;  %v1054_v57 = vsub.s32 7, %v1507_v15  ;;  %v1049_v59 = vrot.slane %v1513_v17, %v1048_v56 }
 0x55f   :  { %v807_v63 = vsub.f32 %v803_v61, %v805_v60 }
 0x560   :  { %v812_v0 = vadd.f32 1e-05, %v808_v62 }
 0x561   :  { %v811_v1 = vadd.f32 1e-05, %v807_v63 }
 0x562   :  { %1373 = vrsqrt.f32 %v812_v0  ;;  %v1055_v0 = vrot.slane %v1513_v17, %v1054_v57 }
 0x563   :  { %1375 = vrsqrt.f32 %v811_v1 }
 0x56c   :  { %v1374_v7 = vpop.eup %1373 }
 0x56d   :  { %v1376_v9 = vpop.eup %1375  ;;  %v816_v10 = vmul.f32 %v1374_v7, %v810_v4 }
 0x56e   :  { %v815_v11 = vmul.f32 %v1376_v9, %v809_v8 }
 0x56f   :  { %v822_v14 = vmul.f32 %v820_v6, %v816_v10 }
 0x570   :  { %v821_v18 = vmul.f32 %v820_v6, %v815_v11 }
 0x571   :  { %v828_v19 = vadd.f32 %v826_v13, %v822_v14 }
 0x572   :  { %v827_v32 = vadd.f32 %v826_v13, %v821_v18 }
 0x574   :  { %1250 = vmatprep.mubr.msk.f32.mxu0 %vm48_vm0, %v827_v32 }
 0x575   :  { %1251 = vmatmul.mubr.msk.f32.vlgmr.msra.gmra.mrb[14].mxu0 %vm48_vm0, %v828_v19 }
 0x648   :  { %v1252_v23 = vpop.f32.mrb[14].mxu0 }
 0x649   :  { %v915_v37 = vadd.f32 %v1252_v23, %v836_v40  ;;  %v909_v24 = vpop.f32.mrb[15].mxu0 }
 0x64a   :  { %v910_v25 = vadd.f32 %v909_v24, %v836_v40 }
 0x64b   :  { %v919_v44 = vmax.f32 %v915_v37, 0.0 }
 0x64c   :  { %v918_v26 = vmax.f32 %v910_v25, 0.0 }
 0x64e   :  { %1269 = vmatprep.mubr.msk.f32.mxu1 %vm932_vm3, %v918_v26 }
 0x64f   :  { %1270 = vmatmul.mubr.msk.f32.vlgmr.msra.gmra.mrb[10].mxu1 %vm932_vm3, %v919_v44 }
 0x722   :  { %v1271_v27 = vpop.f32.mrb[10].mxu1 }
 0x723   :  { %v1011_v28 = vadd.f32 %v1271_v27, %v931_v41  ;;  %v1005_v29 = vpop.f32.mrb[11].mxu1 }
 0x724   :  { %v1006_v30 = vadd.f32 %v1005_v29, %v931_v41 }
 0x725   :  { %v1015_v31 = vadd.f32 %v1011_v28, %v828_v19 }
 0x726   :  { %v1014_v12 = vadd.f32 %v1006_v30, %v827_v32 }
 0x727   :  { %v1019_v16 = vsel %vm48_vm0, %v1015_v31, 0.0  ;;  %v1025_v5 = vmul.f32 %v1015_v31, %v1015_v31 }
 0x728   :  { %1020 = vadd.xlane.f32.xlu1 %v1019_v16  ;;  %v1016_v34 = vsel %vm48_vm0, %v1014_v12, 0.0  ;;  %v1024_v35 = vmul.f32 %v1014_v12, %v1014_v12 }
 0x729   :  { %1017 = vadd.xlane.f32.xlu0 %v1016_v34  ;;  %v1029_v38 = vsel %vm48_vm0, %v1025_v5, 0.0 }
 0x72a   :  { %v1026_v39 = vsel %vm48_vm0, %v1024_v35, 0.0 }
 0x72c   :  { %1030 = vadd.xlane.f32.xlu1 %v1029_v38 }
 0x72d   :  { %1027 = vadd.xlane.f32.xlu0 %v1026_v39 }
 0x7b5   :  { %v1021_v22 = vpop.xlane.xlu1 %1020 }
 0x7b6   :  { %v1023_v42 = vmul.f32 0.03125, %v1021_v22  ;;  %v1018_v43 = vpop.xlane.xlu0 %1017 }
 0x7b7   :  { %v1022_v45 = vmul.f32 0.03125, %v1018_v43 }
 0x7b8   :  { %v1035_v47 = vmul.f32 %v1023_v42, %v1023_v42  ;;  %v1039_v58 = vsub.f32 %v1015_v31, %v1023_v42 }
 0x7b9   :  { %v1031_v46 = vpop.xlane.xlu1 %1030  ;;  %v1034_v50 = vmul.f32 %v1022_v45, %v1022_v45  ;;  %v1038_v61 = vsub.f32 %v1014_v12, %v1022_v45 }
 0x7ba   :  { %v1033_v48 = vmul.f32 0.03125, %v1031_v46  ;;  %v1028_v49 = vpop.xlane.xlu0 %1027 }
 0x7bb   :  { %v1032_v51 = vmul.f32 0.03125, %v1028_v49 }
 0x7bc   :  { %v1037_v52 = vsub.f32 %v1033_v48, %v1035_v47 }
 0x7bd   :  { %v1036_v53 = vsub.f32 %v1032_v51, %v1034_v50 }
 0x7be   :  { %v1041_v54 = vadd.f32 1e-05, %v1037_v52 }
 0x7bf   :  { %v1040_v55 = vadd.f32 1e-05, %v1036_v53 }
 0x7c0   :  { %1377 = vrsqrt.f32 %v1041_v54 }
 0x7c1   :  { %1379 = vrsqrt.f32 %v1040_v55 }
 0x7ca   :  { %v1378_v60 = vpop.eup %1377 }
 0x7cb   :  { %v1380_v62 = vpop.eup %1379  ;;  %v1045_v63 = vmul.f32 %v1378_v60, %v1039_v58 }
 0x7cc   :  { %v1044_v1 = vmul.f32 %v1380_v62, %v1038_v61 }
 0x7cd   :  { %v1051_v2 = vmul.f32 %v1049_v59, %v1045_v63 }
 0x7ce   :  { %v1050_v3 = vmul.f32 %v1049_v59, %v1044_v1 }
 0x7cf   :  { %v1057_v4 = vadd.f32 %v1055_v0, %v1051_v2 }
 0x7d0   :  { %v1056_v6 = vadd.f32 %v1055_v0, %v1050_v3 }
 0x7d1   :  { %1059 = vst.msk [vmem:[#allocation2 + $0x8] sm:$0xff] %vm48_vm0, %v1057_v4 }
 0x7d2   :  { %1058 = vst.msk [vmem:[#allocation2] sm:$0xff] %vm48_vm0, %v1056_v6 }
 0x7d3   :  { %1392 = shalt.err (!%p1389_p4)
}
 0x7d4   :  { %s1393_s8 = scalar_lea.hbm %s1755_s10, 256 }
 0x7d5   :  { %p1394_p5 = scmp.ne.s32.totalorder %s1755_s10, %s1393_s8  ;;  %p1397_p6 = scmp.lt.u32.totalorder %s1393_s8, %s1755_s10 }
 0x7d7   :  { %p1399_p7 = pnand %p1397_p6, %p1394_p5 }
 0x7d9   :  { %1402 = shalt.err (!%p1399_p7)
}
 0x7da   :  { %s1406_s15 = smov 128   ;;  %s1407_s3 = smov 8  }
 0x7db   :  { %1071 = dma.vmem_to_hbm [thread:$0]  %s1066_s7, 256, %s1755_s10, [#allocation3], %s1406_s15, %s1406_s15, %s1407_s3  }
 0x7dc   :  { %1403 = dma.done.wait [#allocation3], 256  }
 0x7dd   :  { %1404 = vsyncadd [#allocation3], 4294967040 }
 0x7de   :  { %1075 = vsyncpa [#allocation3], 1 }

</bundles_post_ra>
